<compile_context>
chip_gen: v7x
topology: tpu7x:2x2x1
jax: 0.10.0
libtpu: 0.0.40
codegen_flags: <defaults>
</compile_context>

<pallas_src>
import numpy as np
import jax
import jax.numpy as jnp
from jax import lax
from jax.experimental import pallas as pl
from jax.experimental.pallas import tpu as pltpu

EMB_DIM = 32
MAX_N_PAD = 64     # minimum sublane padding for the visual-node axis (multiple of 8)
MAX_M_PAD = 128    # minimum lane padding for the text-node axis (lane-dense stores)


def _round_up(x, m):
    return (x + m - 1) // m * m


# --------------------- host-side linear sum assignment ---------------------

def _linear_sum_assignment_np(cost):
    """Pure-numpy rectangular minimum-cost assignment (e-maxx Hungarian /
    Jonker-Volgenant potentials). Matches scipy.optimize.linear_sum_assignment
    for the matrices used here (finite costs)."""
    cost = np.asarray(cost, dtype=np.float64)
    transposed = False
    if cost.shape[0] > cost.shape[1]:
        cost = cost.T
        transposed = True
    n, m = cost.shape
    INF = np.inf
    u = np.zeros(n + 1)
    v = np.zeros(m + 1)
    p = np.zeros(m + 1, dtype=np.int64)      # p[j]: row (1-based) matched to col j
    way = np.zeros(m + 1, dtype=np.int64)
    for i in range(1, n + 1):
        p[0] = i
        j0 = 0
        minv = np.full(m + 1, INF)
        used = np.zeros(m + 1, dtype=bool)
        while True:
            used[j0] = True
            i0 = p[j0]
            delta = INF
            j1 = 0
            for j in range(1, m + 1):
                if not used[j]:
                    cur = cost[i0 - 1, j - 1] - u[i0] - v[j]
                    if cur < minv[j]:
                        minv[j] = cur
                        way[j] = j0
                    if minv[j] < delta:
                        delta = minv[j]
                        j1 = j
            for j in range(m + 1):
                if used[j]:
                    u[p[j]] += delta
                    v[j] -= delta
                else:
                    minv[j] -= delta
            j0 = j1
            if p[j0] == 0:
                break
        while j0 != 0:
            j1 = way[j0]
            p[j0] = p[j1]
            j0 = j1
    rows, cols = [], []
    for j in range(1, m + 1):
        if p[j] != 0:
            rows.append(p[j] - 1)
            cols.append(j - 1)
    rows = np.asarray(rows, dtype=np.int64)
    cols = np.asarray(cols, dtype=np.int64)
    if transposed:
        rows, cols = cols, rows
    order = np.argsort(rows)
    return rows[order], cols[order]


try:  # prefer scipy when available; identical results for these inputs
    from scipy.optimize import linear_sum_assignment as _lsa
except Exception:  # pragma: no cover
    _lsa = _linear_sum_assignment_np


# ------------------------------ Pallas kernel ------------------------------

def _cost_kernel(v_ref, t_ref, cost_ref):
    """cost[i, j] = 1 - |cos(v[i], t[j])| with fused row-wise L2 normalization.

    Refs are 2-D because the leading batch dim is squeezed by the BlockSpec:
      v_ref: (n_pad, D), t_ref: (m_pad, D), cost_ref: (n_pad, m_pad).
    Normalization: x * rsqrt(max(sum(x^2), eps^2)) ~ F.normalize(p=2, dim=1)
    with eps=1e-12 (one EUP rsqrt, no sqrt-then-divide pair). The similarity
    matrix is one MXU dot contracting the LAST axes of both operands.
    """
    v = v_ref[...].astype(jnp.float32)
    t = t_ref[...].astype(jnp.float32)
    eps2 = jnp.float32(1e-24)   # (1e-12)^2, clamp on the sum of squares
    v = v * lax.rsqrt(jnp.maximum(jnp.sum(v * v, axis=1, keepdims=True), eps2))
    t = t * lax.rsqrt(jnp.maximum(jnp.sum(t * t, axis=1, keepdims=True), eps2))
    sim = lax.dot_general(v, t, (((1,), (1,)), ((), ())),
                          preferred_element_type=jnp.float32)
    cost_ref[...] = (1.0 - jnp.abs(sim)).astype(cost_ref.dtype)


# --------------------------------- wrappers --------------------------------

@jax.jit
def batched_cost_matrices(vis, txt):
    """vis: (B, n_pad, D), txt: (B, m_pad, D) raw (un-normalized) rows.
    Returns (B, n_pad, m_pad) cosine-distance tensor from a single pallas_call
    with a parallel batch grid axis (normalization fused in-kernel)."""
    B, n_pad, d = vis.shape
    _, m_pad, d2 = txt.shape
    assert d == d2
    return pl.pallas_call(
        _cost_kernel,
        out_shape=jax.ShapeDtypeStruct((B, n_pad, m_pad), jnp.float32),
        grid=(B,),
        in_specs=[
            pl.BlockSpec((None, n_pad, d), lambda b: (b, 0, 0)),   # squeeze batch
            pl.BlockSpec((None, m_pad, d), lambda b: (b, 0, 0)),
        ],
        out_specs=pl.BlockSpec((None, n_pad, m_pad), lambda b: (b, 0, 0)),
        compiler_params=pltpu.CompilerParams(
            dimension_semantics=("parallel",)),
    )(vis, txt)


@jax.jit
def _gather_and_cost(ocr_features, query_features, vis_idx, txt_idx):
    """Gather fixed-shape padded node subsets from the raw token banks and
    compute all cost matrices in one batched Pallas call."""
    vis = jnp.take(ocr_features, vis_idx, axis=0).astype(jnp.float32)   # (B, n_pad, D)
    txt = jnp.take(query_features, txt_idx, axis=0).astype(jnp.float32) # (B, m_pad, D)
    return batched_cost_matrices(vis, txt)


# -------------------------------- module port ------------------------------

class SoftHdPallas:
    """JAX/Pallas port of the PyTorch SoftHd module's forward pass."""

    def __init__(self, emb_dimension, td=0.5, ti=0.5):
        self.sqrt_dim = emb_dimension ** 0.5
        self.td = td
        self.ti = ti
        # attention_query / attention_key Linear(emb, emb) params exist in the
        # PyTorch __init__ but are never used by forward (create_2clique is
        # dead code with a `pass` body); kept only for parameter parity.
        kq_w, kq_b, kk_w, kk_b = jax.random.split(jax.random.PRNGKey(42), 4)
        bound = 1.0 / (emb_dimension ** 0.5)
        self.wq = jax.random.uniform(kq_w, (emb_dimension, emb_dimension), jnp.float32, -bound, bound)
        self.bq = jax.random.uniform(kq_b, (emb_dimension,), jnp.float32, -bound, bound)
        self.wk = jax.random.uniform(kk_w, (emb_dimension, emb_dimension), jnp.float32, -bound, bound)
        self.bk = jax.random.uniform(kk_b, (emb_dimension,), jnp.float32, -bound, bound)

    def cdist(self, set1, set2):
        """Pairwise cosine-distance matrix 1 - |cos(set1_i, set2_j)|, (N, M)."""
        n, d = set1.shape
        m, _ = set2.shape
        n_pad = max(MAX_N_PAD, _round_up(n, 8))
        m_pad = max(MAX_M_PAD, _round_up(m, 128))
        v = jnp.zeros((1, n_pad, d), jnp.float32).at[0, :n].set(set1.astype(jnp.float32))
        t = jnp.zeros((1, m_pad, d), jnp.float32).at[0, :m].set(set2.astype(jnp.float32))
        return batched_cost_matrices(v, t)[0, :n, :m]

    def hungarian_distance(self, visual_tokens, word_tokens):
        cost = self.cdist(visual_tokens, word_tokens)
        # TODO(synk): linear_sum_assignment (Hungarian) is a sequential
        # combinatorial solver with no clean Pallas equivalent; it runs
        # host-side on the kernel-produced cost matrix (the PyTorch reference
        # also detaches to CPU numpy for this step).
        cost_np = np.asarray(jax.device_get(cost))
        r, c = _lsa(cost_np)
        return jnp.asarray(cost_np[r, c].mean(), jnp.float32)

    def forward(self, ocr_features, query_features, ocr_idxs, query_idxs,
                images=None, dates=None):
        B = len(ocr_idxs)
        ns = [int(np.asarray(ix).shape[0]) for ix in ocr_idxs]
        ms = [int(np.asarray(ix).shape[0]) for ix in query_idxs]
        n_pad = max(MAX_N_PAD, _round_up(max(ns), 8))
        m_pad = max(MAX_M_PAD, _round_up(max(ms), 128))

        # Fixed-shape padded gather indices (pad slots reuse row 0; padded cost
        # rows/cols are sliced away before the assignment).
        vis_idx = np.zeros((B, n_pad), np.int32)
        txt_idx = np.zeros((B, m_pad), np.int32)
        for b in range(B):
            vis_idx[b, :ns[b]] = np.asarray(ocr_idxs[b], dtype=np.int32)
            txt_idx[b, :ms[b]] = np.asarray(query_idxs[b], dtype=np.int32)

        # ONE batched pallas_call for all pairs (normalize + cost fused).
        cost = _gather_and_cost(jnp.asarray(ocr_features), jnp.asarray(query_features),
                                jnp.asarray(vis_idx), jnp.asarray(txt_idx))

        # Single device->host transfer; Hungarian + mean fully on host, slicing
        # with the TRUE per-pair (n, m) so padding never enters the assignment.
        cost_np = np.asarray(jax.device_get(cost))
        d = []
        for b in range(B):
            c = cost_np[b, :ns[b], :ms[b]]
            r, cidx = _lsa(c)
            d.append(c[r, cidx].mean())
        return jnp.asarray(np.stack(d), dtype=jnp.float32)


if __name__ == "__main__":
    key = jax.random.PRNGKey(0)
    k1, k2 = jax.random.split(key)

    # Small deterministic inputs consistent with the forward signature:
    # flat token banks + per-batch index lists selecting node subsets.
    ocr_features = jax.random.normal(k1, (16, EMB_DIM), jnp.float32)
    query_features = jax.random.normal(k2, (12, EMB_DIM), jnp.float32)
    ocr_idxs = [jnp.arange(0, 8), jnp.arange(8, 15)]      # batch=2 (8 and 7 visual nodes)
    query_idxs = [jnp.arange(0, 6), jnp.arange(6, 12)]    # 6 and 6 text nodes

    model = SoftHdPallas(EMB_DIM, td=0.5, ti=0.5)

    # Quick correctness check of the Pallas cost kernel against pure JAX.
    v0 = ocr_features[np.asarray(ocr_idxs[0])]
    t0 = query_features[np.asarray(query_idxs[0])]
    vn = v0 / jnp.maximum(jnp.linalg.norm(v0, axis=1, keepdims=True), 1e-12)
    tn = t0 / jnp.maximum(jnp.linalg.norm(t0, axis=1, keepdims=True), 1e-12)
    ref = 1.0 - jnp.abs(vn @ tn.T)
    got = model.cdist(v0, t0)
    assert bool(jnp.max(jnp.abs(got - ref)) < 1e-5)

    out = model.forward(ocr_features, query_features, ocr_idxs, query_idxs,
                        images=None, dates=None)
    out = jax.block_until_ready(out)
    assert out.shape == (2,) and out.dtype == jnp.float32
    assert bool(jnp.all(jnp.isfinite(out)))
    assert bool(jnp.all(out >= 0.0)) and bool(jnp.all(out <= 1.0))
    print("KERNEL_OK")
</pallas_src>

<mosaic_0001>
module attributes {stable_mosaic.version = 11 : i64} {
  func.func @_cost_kernel(%arg0: i32, %arg1: memref<1x64x32xf32, #tpu.memory_space<vmem>>, %arg2: memref<1x128x32xf32, #tpu.memory_space<vmem>>, %arg3: memref<1x64x128xf32, #tpu.memory_space<vmem>>) attributes {dimension_semantics = [#tpu.dimension_semantics<parallel>], iteration_bounds = array<i64: 1>, scalar_prefetch = 0 : i64, scratch_operands = 0 : i64, tpu.core_type = #tpu.core_type<tc>, window_params = [{transform_indices = @transform_0, window_bounds = array<i64: 1, 64, 32>}, {transform_indices = @transform_1, window_bounds = array<i64: 1, 128, 32>}, {transform_indices = @transform_2, window_bounds = array<i64: 1, 64, 128>}]} {
    %c0 = arith.constant 0 : index
    %c0_0 = arith.constant 0 : index
    %c0_1 = arith.constant 0 : index
    %0 = vector.load %arg1[%c0, %c0_0, %c0_1] : memref<1x64x32xf32, #tpu.memory_space<vmem>>, vector<1x64x32xf32>
    %1 = vector.shape_cast %0 : vector<1x64x32xf32> to vector<64x32xf32>
    %c0_2 = arith.constant 0 : index
    %c0_3 = arith.constant 0 : index
    %c0_4 = arith.constant 0 : index
    %2 = vector.load %arg2[%c0_2, %c0_3, %c0_4] : memref<1x128x32xf32, #tpu.memory_space<vmem>>, vector<1x128x32xf32>
    %3 = vector.shape_cast %2 : vector<1x128x32xf32> to vector<128x32xf32>
    %4 = arith.mulf %1, %1 : vector<64x32xf32>
    %cst = arith.constant dense<0.000000e+00> : vector<64xf32>
    %5 = vector.multi_reduction <add>, %4, %cst [1] : vector<64x32xf32> to vector<64xf32>
    %6 = vector.shape_cast %5 : vector<64xf32> to vector<64x1xf32>
    %cst_5 = arith.constant 1.000000e-24 : f32
    %7 = vector.broadcast %cst_5 : f32 to vector<64x1xf32>
    %8 = arith.maximumf %6, %7 : vector<64x1xf32>
    %9 = math.rsqrt %8 : vector<64x1xf32>
    %10 = vector.broadcast %9 : vector<64x1xf32> to vector<64x32xf32>
    %11 = arith.mulf %1, %10 : vector<64x32xf32>
    %12 = arith.mulf %3, %3 : vector<128x32xf32>
    %cst_6 = arith.constant dense<0.000000e+00> : vector<128xf32>
    %13 = vector.multi_reduction <add>, %12, %cst_6 [1] : vector<128x32xf32> to vector<128xf32>
    %14 = vector.shape_cast %13 : vector<128xf32> to vector<128x1xf32>
    %cst_7 = arith.constant 1.000000e-24 : f32
    %15 = vector.broadcast %cst_7 : f32 to vector<128x1xf32>
    %16 = arith.maximumf %14, %15 : vector<128x1xf32>
    %17 = math.rsqrt %16 : vector<128x1xf32>
    %18 = vector.broadcast %17 : vector<128x1xf32> to vector<128x32xf32>
    %19 = arith.mulf %3, %18 : vector<128x32xf32>
    %cst_8 = arith.constant dense<0.000000e+00> : vector<64x128xf32>
    %20 = tpu.matmul %11, %19, %cst_8 {dimension_numbers = #tpu.dot_dimension_numbers<[1], [1], [0], [0], [0, 0, 1, 0], [], []>} : vector<64x32xf32>, vector<128x32xf32>, vector<64x128xf32> -> vector<64x128xf32>
    %21 = math.absf %20 : vector<64x128xf32>
    %cst_9 = arith.constant 1.000000e+00 : f32
    %22 = vector.broadcast %cst_9 : f32 to vector<64x128xf32>
    %23 = arith.subf %22, %21 : vector<64x128xf32>
    %c0_10 = arith.constant 0 : index
    %c0_11 = arith.constant 0 : index
    %c0_12 = arith.constant 0 : index
    %24 = vector.load %arg3[%c0_10, %c0_11, %c0_12] : memref<1x64x128xf32, #tpu.memory_space<vmem>>, vector<1x64x128xf32>
    %25 = vector.shape_cast %24 : vector<1x64x128xf32> to vector<64x128xf32>
    %26 = vector.shape_cast %23 : vector<64x128xf32> to vector<1x64x128xf32>
    tpu.vector_store %arg3[%c0_10, %c0_11, %c0_12], %26 {strides = array<i32>} : memref<1x64x128xf32, #tpu.memory_space<vmem>>, vector<1x64x128xf32>,
    return
  }
  func.func @transform_0(%arg0: i32) -> (i32, i32, i32) {
    %c0_i32 = arith.constant 0 : i32
    %c0_i32_0 = arith.constant 0 : i32
    %c0_i32_1 = arith.constant 0 : i32
    return %arg0, %c0_i32, %c0_i32_0 : i32, i32, i32
  }
  func.func @transform_1(%arg0: i32) -> (i32, i32, i32) {
    %c0_i32 = arith.constant 0 : i32
    %c0_i32_0 = arith.constant 0 : i32
    %c0_i32_1 = arith.constant 0 : i32
    return %arg0, %c0_i32, %c0_i32_0 : i32, i32, i32
  }
  func.func @transform_2(%arg0: i32) -> (i32, i32, i32) {
    %c0_i32 = arith.constant 0 : i32
    %c0_i32_0 = arith.constant 0 : i32
    %c0_i32_1 = arith.constant 0 : i32
    return %arg0, %c0_i32, %c0_i32_0 : i32, i32, i32
  }
}

</mosaic_0001>

<bundles_post_ra>
// kernel: batched_cost_matrices.1
= control target key start
LH: loop header
LB: loop body
LE: loop exit
PB: predicated region body
PF: predicated region fallthrough
CT: control target
= control target key end

     0   :  { %vm44_vm0 = vcmask 261120   ;;  %s977_s0 = inlined_call_operand.vmem [shape: f32[1,64,32], index: 0, kind: input, shape index: {}]   ;;  %s978_s1 = inlined_call_operand.vmem [shape: f32[1,128,32], index: 1, kind: input, shape index: {}]   ;;  %s979_s2 = inlined_call_operand.hbm [shape: f32[1,64,128], index: 2, kind: output, shape index: {}]  }
   0x1   :  { %v674_v0 = vld [vmem:[%s978_s1] sm:$0xff]  ;;  %v679_v1 = vld [vmem:[%s978_s1 + $0x10] sm:$0xff]  ;;  %v684_v2 = vld [vmem:[%s978_s1 + $0x8] sm:$0xff] }
   0x2   :  { %v93_v3 = vmul.f32 %v674_v0, %v674_v0  ;;  %v95_v4 = vmul.f32 %v679_v1, %v679_v1  ;;  %v94_v5 = vmul.f32 %v684_v2, %v684_v2  ;;  %v695_v6 = vld [vmem:[%s978_s1 + $0x18] sm:$0xff]  ;;  %v702_v8 = vld [vmem:[%s978_s1 + $0x28] sm:$0xff]  ;;  %v707_v9 = vld [vmem:[%s978_s1 + $0x20] sm:$0xff] }
   0x3   :  { %v96_v7 = vmul.f32 %v695_v6, %v695_v6  ;;  %v98_v14 = vmul.f32 %v702_v8, %v702_v8  ;;  %v97_v15 = vmul.f32 %v707_v9, %v707_v9  ;;  %v720_v16 = vld [vmem:[%s978_s1 + $0x38] sm:$0xff]  ;;  %v725_v17 = vld [vmem:[%s978_s1 + $0x30] sm:$0xff] }
   0x4   :  { %v109_v10 = vsel %vm44_vm0, %v93_v3, 0.0  ;;  %v115_v11 = vsel %vm44_vm0, %v95_v4, 0.0  ;;  %v112_v12 = vsel %vm44_vm0, %v94_v5, 0.0 }
   0x5   :  { %110 = vadd.xlane.f32.xlu0 %v109_v10  ;;  %116 = vadd.xlane.f32.xlu1 %v115_v11  ;;  %v118_v13 = vsel %vm44_vm0, %v96_v7, 0.0 }
   0x9   :  { %113 = vadd.xlane.f32.xlu0 %v112_v12  ;;  %119 = vadd.xlane.f32.xlu1 %v118_v13 }
   0xa   :  { %7 = vsyncpa [#allocation3], 0  ;;  %v124_v18 = vsel %vm44_vm0, %v98_v14, 0.0  ;;  %v121_v19 = vsel %vm44_vm0, %v97_v15, 0.0  ;;  %v100_v20 = vmul.f32 %v720_v16, %v720_v16  ;;  %v99_v21 = vmul.f32 %v725_v17, %v725_v17  ;;  %v736_v22 = vld [vmem:[%s978_s1 + $0x48] sm:$0xff]  ;;  %v741_v23 = vld [vmem:[%s978_s1 + $0x40] sm:$0xff] }
   0xb   :  { %v102_v26 = vmul.f32 %v736_v22, %v736_v22  ;;  %v101_v27 = vmul.f32 %v741_v23, %v741_v23  ;;  %v752_v28 = vld [vmem:[%s978_s1 + $0x58] sm:$0xff]  ;;  %v757_v29 = vld [vmem:[%s978_s1 + $0x50] sm:$0xff]  ;;  %v768_v34 = vld [vmem:[%s978_s1 + $0x68] sm:$0xff] }
   0xc   :  { %v130_v24 = vsel %vm44_vm0, %v100_v20, 0.0  ;;  %v127_v25 = vsel %vm44_vm0, %v99_v21, 0.0  ;;  %v104_v32 = vmul.f32 %v752_v28, %v752_v28  ;;  %v103_v33 = vmul.f32 %v757_v29, %v757_v29  ;;  %v773_v35 = vld [vmem:[%s978_s1 + $0x60] sm:$0xff]  ;;  %v784_v40 = vld [vmem:[%s978_s1 + $0x78] sm:$0xff]  ;;  %v789_v41 = vld [vmem:[%s978_s1 + $0x70] sm:$0xff] }
   0xd   :  { %125 = vadd.xlane.f32.xlu1 %v124_v18  ;;  %122 = vadd.xlane.f32.xlu0 %v121_v19  ;;  %v136_v30 = vsel %vm44_vm0, %v102_v26, 0.0  ;;  %v133_v31 = vsel %vm44_vm0, %v101_v27, 0.0  ;;  %v106_v38 = vmul.f32 %v768_v34, %v768_v34  ;;  %v105_v39 = vmul.f32 %v773_v35, %v773_v35  ;;  %v800_v46 = vld [vmem:[%s977_s0 + $0x20] sm:$0xff]  ;;  %v816_v52 = vld [vmem:[%s977_s0 + $0x28] sm:$0xff]  ;;  %v832_v58 = vld [vmem:[%s977_s0 + $0x30] sm:$0xff] }
   0xe   :  { %v142_v36 = vsel %vm44_vm0, %v104_v32, 0.0  ;;  %v139_v37 = vsel %vm44_vm0, %v103_v33, 0.0  ;;  %v108_v44 = vmul.f32 %v784_v40, %v784_v40  ;;  %v107_v45 = vmul.f32 %v789_v41, %v789_v41  ;;  %v805_v47 = vld [vmem:[%s977_s0] sm:$0xff]  ;;  %v821_v53 = vld [vmem:[%s977_s0 + $0x8] sm:$0xff]  ;;  %v837_v59 = vld [vmem:[%s977_s0 + $0x10] sm:$0xff] }
   0xf   :  { %v148_v42 = vsel %vm44_vm0, %v106_v38, 0.0  ;;  %v145_v43 = vsel %vm44_vm0, %v105_v39, 0.0  ;;  %v40_v50 = vmul.f32 %v800_v46, %v800_v46  ;;  %v36_v51 = vmul.f32 %v805_v47, %v805_v47  ;;  %v848_v3 = vld [vmem:[%s977_s0 + $0x38] sm:$0xff]  ;;  %vm868_vm1 = vmpackc.low %vm44_vm0, %vm44_vm0 }
  0x10   :  { %v154_v48 = vsel %vm44_vm0, %v108_v44, 0.0  ;;  %v151_v49 = vsel %vm44_vm0, %v107_v45, 0.0  ;;  %v41_v56 = vmul.f32 %v816_v52, %v816_v52  ;;  %v37_v57 = vmul.f32 %v821_v53, %v821_v53  ;;  %v853_v4 = vld [vmem:[%s977_s0 + $0x18] sm:$0xff]  ;;  %s653_s0 = smov [#allocation2]  }
  0x11   :  { %131 = vadd.xlane.f32.xlu1 %v130_v24  ;;  %128 = vadd.xlane.f32.xlu0 %v127_v25  ;;  %v57_v54 = vsel %vm44_vm0, %v40_v50, 0.0  ;;  %v45_v55 = vsel %vm44_vm0, %v36_v51, 0.0  ;;  %v42_v62 = vmul.f32 %v832_v58, %v832_v58  ;;  %v38_v63 = vmul.f32 %v837_v59, %v837_v59  ;;  %s411_s28 = sshll.u32 %s653_s0, 4  ;;  %s412_s28 = int_to_ptr.vmem [resolvable:$true] %s411_s28 }
  0x12   :  { %v60_v60 = vsel %vm44_vm0, %v41_v56, 0.0  ;;  %v48_v61 = vsel %vm44_vm0, %v37_v57, 0.0  ;;  %v43_v10 = vmul.f32 %v848_v3, %v848_v3  ;;  %v39_v11 = vmul.f32 %v853_v4, %v853_v4  ;;  %s629_s29 = scalar_lea.vmem %s412_s28, 1024  ;;  %p634_p1 = scmp.lt.s32.totalorder %s412_s28, %s412_s28 }
  0x13   :  { %v63_v5 = vsel %vm44_vm0, %v42_v62, 0.0  ;;  %v51_v7 = vsel %vm44_vm0, %v38_v63, 0.0  ;;  %p630_p0 = scmp.ne.s32.totalorder %s412_s28, %s629_s29  ;;  %p635_p2 = scmp.lt.s32.totalorder %s629_s29, %s629_s29 }
  0x14   :  { %v66_v12 = vsel %vm44_vm0, %v43_v10, 0.0  ;;  %v54_v13 = vsel %vm44_vm0, %v39_v11, 0.0 }
  0x15   :  { %137 = vadd.xlane.f32.xlu1 %v136_v30  ;;  %134 = vadd.xlane.f32.xlu0 %v133_v31  ;;  %p636_p3 = por %p635_p2, %p634_p1 }
  0x17   :  { %p637_p4 = pnand %p636_p3, %p630_p0 }
  0x19   :  { %143 = vadd.xlane.f32.xlu1 %v142_v36  ;;  %140 = vadd.xlane.f32.xlu0 %v139_v37 }
  0x1d   :  { %149 = vadd.xlane.f32.xlu1 %v148_v42  ;;  %146 = vadd.xlane.f32.xlu0 %v145_v43 }
  0x21   :  { %155 = vadd.xlane.f32.xlu1 %v154_v48  ;;  %152 = vadd.xlane.f32.xlu0 %v151_v49 }
  0x25   :  { %58 = vadd.xlane.f32.xlu1 %v57_v54  ;;  %46 = vadd.xlane.f32.xlu0 %v45_v55 }
  0x29   :  { %61 = vadd.xlane.f32.xlu1 %v60_v60  ;;  %49 = vadd.xlane.f32.xlu0 %v48_v61 }
  0x2d   :  { %64 = vadd.xlane.f32.xlu1 %v63_v5  ;;  %52 = vadd.xlane.f32.xlu0 %v51_v7 }
  0x31   :  { %67 = vadd.xlane.f32.xlu1 %v66_v12  ;;  %55 = vadd.xlane.f32.xlu0 %v54_v13 }
  0x92   :  { %v111_v14 = vpop.xlane.xlu0 %110  ;;  %v117_v15 = vpop.xlane.xlu1 %116 }
  0x93   :  { %v157_v18 = vmax.f32 %v111_v14, 1e-24  ;;  %v159_v19 = vmax.f32 %v117_v15, 1e-24 }
  0x95   :  { %581 = vrsqrt.f32 %v159_v19 }
  0x96   :  { %v114_v20 = vpop.xlane.xlu0 %113  ;;  %v120_v21 = vpop.xlane.xlu1 %119  ;;  %583 = vrsqrt.f32 %v157_v18 }
  0x97   :  { %v158_v24 = vmax.f32 %v114_v20, 1e-24  ;;  %v160_v25 = vmax.f32 %v120_v21, 1e-24 }
  0x99   :  { %585 = vrsqrt.f32 %v158_v24 }
  0x9a   :  { %587 = vrsqrt.f32 %v160_v25  ;;  %v126_v26 = vpop.xlane.xlu1 %125  ;;  %v123_v27 = vpop.xlane.xlu0 %122 }
  0x9b   :  { %v162_v30 = vmax.f32 %v126_v26, 1e-24  ;;  %v161_v31 = vmax.f32 %v123_v27, 1e-24 }
  0x9d   :  { %589 = vrsqrt.f32 %v162_v30 }
  0x9e   :  { %591 = vrsqrt.f32 %v161_v31  ;;  %v132_v32 = vpop.xlane.xlu1 %131  ;;  %v129_v33 = vpop.xlane.xlu0 %128 }
  0x9f   :  { %v582_v36 = vpop.eup %581  ;;  %v164_v37 = vmax.f32 %v132_v32, 1e-24  ;;  %v163_v39 = vmax.f32 %v129_v33, 1e-24 }
  0xa0   :  { %v584_v38 = vpop.eup %583  ;;  %v191_v45 = vmul.f32 %v582_v36, %v679_v1 }
  0xa1   :  { %v189_v49 = vmul.f32 %v584_v38, %v674_v0  ;;  %593 = vrsqrt.f32 %v164_v37 }
  0xa2   :  { %v138_v42 = vpop.xlane.xlu1 %137  ;;  %v135_v43 = vpop.xlane.xlu0 %134  ;;  %595 = vrsqrt.f32 %v163_v39 }
  0xa3   :  { %v586_v44 = vpop.eup %585  ;;  %v166_v0 = vmax.f32 %v138_v42, 1e-24 }
  0xa4   :  { %v588_v48 = vpop.eup %587  ;;  %v190_v50 = vmul.f32 %v586_v44, %v684_v2  ;;  %v165_v2 = vmax.f32 %v135_v43, 1e-24 }
  0xa5   :  { %v192_v54 = vmul.f32 %v588_v48, %v695_v6  ;;  %597 = vrsqrt.f32 %v166_v0 }
  0xa6   :  { %v514_v55 = vpack.c.bf16 %v190_v50, %v189_v49  ;;  %v144_v56 = vpop.xlane.xlu1 %143  ;;  %v141_v57 = vpop.xlane.xlu0 %140  ;;  %599 = vrsqrt.f32 %v165_v2 }
  0xa7   :  { %v590_v60 = vpop.eup %589  ;;  %v520_v1 = vpack.c.bf16 %v192_v54, %v191_v45  ;;  %v168_v14 = vmax.f32 %v144_v56, 1e-24  ;;  %v167_v15 = vmax.f32 %v141_v57, 1e-24 }
  0xa8   :  { %v592_v61 = vpop.eup %591  ;;  %516 = vmatprep.subr.msk.bf16.mxu0 %vm868_vm1, %v514_v55  ;;  %562 = vmatprep.subr.msk.bf16.mxu1 %vm868_vm1, %v514_v55  ;;  %v194_v62 = vmul.f32 %v590_v60, %v702_v8 }
  0xa9   :  { %519 = vmatpush3.bf16.xpose.msk.msra.mxu0 %vm868_vm1, %v514_v55  ;;  %570 = vmatpush3.bf16.xpose.msk.msra.mxu1 %vm868_vm1, %v514_v55  ;;  %v193_v6 = vmul.f32 %v592_v61, %v707_v9  ;;  %601 = vrsqrt.f32 %v168_v14 }
  0xaa   :  { %522 = vmatprep.subr.msk.bf16.mxu0 %vm868_vm1, %v520_v1  ;;  %563 = vmatprep.subr.msk.bf16.mxu1 %vm868_vm1, %v520_v1  ;;  %v150_v63 = vpop.xlane.xlu1 %149  ;;  %v147_v5 = vpop.xlane.xlu0 %146  ;;  %603 = vrsqrt.f32 %v167_v15 }
  0xab   :  { %v594_v7 = vpop.eup %593  ;;  %v526_v10 = vpack.c.bf16 %v194_v62, %v193_v6  ;;  %v170_v27 = vmax.f32 %v150_v63, 1e-24 }
  0xac   :  { %v596_v13 = vpop.eup %595  ;;  %v196_v9 = vmul.f32 %v594_v7, %v720_v16 }
  0xad   :  { %v195_v8 = vmul.f32 %v596_v13, %v725_v17  ;;  %v169_v17 = vmax.f32 %v147_v5, 1e-24 }
  0xae   :  { %v156_v11 = vpop.xlane.xlu1 %155  ;;  %v153_v12 = vpop.xlane.xlu0 %152 }
  0xaf   :  { %v598_v24 = vpop.eup %597  ;;  %v532_v25 = vpack.c.bf16 %v196_v9, %v195_v8  ;;  %v172_v38 = vmax.f32 %v156_v11, 1e-24  ;;  %v171_v42 = vmax.f32 %v153_v12, 1e-24 }
  0xb0   :  { %v600_v26 = vpop.eup %599  ;;  %v198_v30 = vmul.f32 %v598_v24, %v736_v22 }
  0xb1   :  { %525 = vmatpush3.bf16.xpose.msk.msra.mxu0 %vm868_vm1, %v520_v1  ;;  %571 = vmatpush3.bf16.xpose.msk.msra.mxu1 %vm868_vm1, %v520_v1  ;;  %v197_v16 = vmul.f32 %v600_v26, %v741_v23 }
  0xb2   :  { %528 = vmatprep.subr.msk.bf16.mxu0 %vm868_vm1, %v526_v10  ;;  %564 = vmatprep.subr.msk.bf16.mxu1 %vm868_vm1, %v526_v10  ;;  %v59_v18 = vpop.xlane.xlu1 %58  ;;  %v47_v19 = vpop.xlane.xlu0 %46 }
  0xb3   :  { %v73_v20 = vmax.f32 %v59_v18, 1e-24  ;;  %v69_v21 = vmax.f32 %v47_v19, 1e-24  ;;  %v602_v31 = vpop.eup %601  ;;  %v538_v33 = vpack.c.bf16 %v198_v30, %v197_v16 }
  0xb4   :  { %v604_v32 = vpop.eup %603  ;;  %v200_v43 = vmul.f32 %v602_v31, %v752_v28 }
  0xb5   :  { %605 = vrsqrt.f32 %v73_v20  ;;  %v199_v22 = vmul.f32 %v604_v32, %v757_v29 }
  0xb6   :  { %607 = vrsqrt.f32 %v69_v21  ;;  %v50_v48 = vpop.xlane.xlu0 %49 }
  0xb7   :  { %609 = vrsqrt.f32 %v170_v27  ;;  %v544_v44 = vpack.c.bf16 %v200_v43, %v199_v22  ;;  %v70_v2 = vmax.f32 %v50_v48, 1e-24 }
  0xb8   :  { %611 = vrsqrt.f32 %v169_v17 }
  0xb9   :  { %531 = vmatpush3.bf16.xpose.msk.msra.mxu0 %vm868_vm1, %v526_v10  ;;  %572 = vmatpush3.bf16.xpose.msk.msra.mxu1 %vm868_vm1, %v526_v10  ;;  %613 = vrsqrt.f32 %v172_v38 }
  0xba   :  { %534 = vmatprep.subr.msk.bf16.mxu0 %vm868_vm1, %v532_v25  ;;  %565 = vmatprep.subr.msk.bf16.mxu1 %vm868_vm1, %v532_v25  ;;  %615 = vrsqrt.f32 %v171_v42  ;;  %v53_v55 = vpop.xlane.xlu0 %52 }
  0xbb   :  { %v71_v61 = vmax.f32 %v53_v55, 1e-24 }
  0xbe   :  { %v56_v0 = vpop.xlane.xlu0 %55 }
  0xbf   :  { %v606_v36 = vpop.eup %605  ;;  %v72_v63 = vmax.f32 %v56_v0, 1e-24 }
  0xc0   :  { %v608_v37 = vpop.eup %607  ;;  %v89_v39 = vmul.f32 %v606_v36, %v800_v46 }
  0xc1   :  { %537 = vmatpush3.bf16.xpose.msk.msra.mxu0 %vm868_vm1, %v532_v25  ;;  %573 = vmatpush3.bf16.xpose.msk.msra.mxu1 %vm868_vm1, %v532_v25  ;;  %v85_v23 = vmul.f32 %v608_v37, %v805_v47  ;;  %v610_v46 = vpop.eup %609  ;;  %v62_v47 = vpop.xlane.xlu1 %61 }
  0xc2   :  { %540 = vmatprep.subr.msk.bf16.mxu0 %vm868_vm1, %v538_v33  ;;  %566 = vmatprep.subr.msk.bf16.mxu1 %vm868_vm1, %v538_v33  ;;  %v612_v45 = vpop.eup %611  ;;  %v202_v29 = vmul.f32 %v610_v46, %v768_v34  ;;  %v74_v57 = vmax.f32 %v62_v47, 1e-24 }
  0xc3   :  { %502 = vmatprep.mubr.msk.f32.mxu0 %vm44_vm0, %v85_v23  ;;  %508 = vmatprep.mubr.msk.f32.mxu1 %vm44_vm0, %v89_v39  ;;  %v201_v28 = vmul.f32 %v612_v45, %v773_v35  ;;  %v614_v50 = vpop.eup %613 }
  0xc4   :  { %v616_v56 = vpop.eup %615  ;;  %v204_v35 = vmul.f32 %v614_v50, %v784_v40  ;;  %617 = vrsqrt.f32 %v74_v57 }
  0xc5   :  { %v65_v49 = vpop.xlane.xlu1 %64  ;;  %v550_v54 = vpack.c.bf16 %v202_v29, %v201_v28  ;;  %v203_v34 = vmul.f32 %v616_v56, %v789_v41 }
  0xc6   :  { %v75_v60 = vmax.f32 %v65_v49, 1e-24 }
  0xc7   :  { %v556_v62 = vpack.c.bf16 %v204_v35, %v203_v34 }
  0xc8   :  { %619 = vrsqrt.f32 %v75_v60 }
  0xc9   :  { %543 = vmatpush3.bf16.xpose.msk.msra.mxu0 %vm868_vm1, %v538_v33  ;;  %574 = vmatpush3.bf16.xpose.msk.msra.mxu1 %vm868_vm1, %v538_v33  ;;  %v68_v1 = vpop.xlane.xlu1 %67  ;;  %621 = vrsqrt.f32 %v71_v61 }
  0xca   :  { %546 = vmatprep.subr.msk.bf16.mxu0 %vm868_vm1, %v544_v44  ;;  %567 = vmatprep.subr.msk.bf16.mxu1 %vm868_vm1, %v544_v44  ;;  %v76_v6 = vmax.f32 %v68_v1, 1e-24  ;;  %623 = vrsqrt.f32 %v70_v2 }
  0xcc   :  { %625 = vrsqrt.f32 %v76_v6 }
  0xcd   :  { %627 = vrsqrt.f32 %v72_v63 }
  0xce   :  { %v618_v40 = vpop.eup %617 }
  0xcf   :  { %v90_v15 = vmul.f32 %v618_v40, %v816_v52 }
  0xd1   :  { %549 = vmatpush3.bf16.xpose.msk.msra.mxu0 %vm868_vm1, %v544_v44  ;;  %575 = vmatpush3.bf16.xpose.msk.msra.mxu1 %vm868_vm1, %v544_v44 }
  0xd2   :  { %552 = vmatprep.subr.msk.bf16.mxu0 %vm868_vm1, %v550_v54  ;;  %568 = vmatprep.subr.msk.bf16.mxu1 %vm868_vm1, %v550_v54  ;;  %v620_v41 = vpop.eup %619 }
  0xd3   :  { %v622_v5 = vpop.eup %621  ;;  %v91_v13 = vmul.f32 %v620_v41, %v832_v58 }
  0xd4   :  { %v624_v7 = vpop.eup %623  ;;  %v87_v12 = vmul.f32 %v622_v5, %v837_v59 }
  0xd5   :  { %v86_v14 = vmul.f32 %v624_v7, %v821_v53 }
  0xd6   :  { %v626_v10 = vpop.eup %625 }
  0xd7   :  { %v628_v11 = vpop.eup %627  ;;  %v92_v51 = vmul.f32 %v626_v10, %v848_v3 }
  0xd8   :  { %v88_v8 = vmul.f32 %v628_v11, %v853_v4 }
  0xd9   :  { %555 = vmatpush3.bf16.xpose.msk.msra.mxu0 %vm868_vm1, %v550_v54  ;;  %576 = vmatpush3.bf16.xpose.msk.msra.mxu1 %vm868_vm1, %v550_v54 }
  0xda   :  { %558 = vmatprep.subr.msk.bf16.mxu0 %vm868_vm1, %v556_v62  ;;  %569 = vmatprep.subr.msk.bf16.mxu1 %vm868_vm1, %v556_v62 }
  0xe1   :  { %561 = vmatpush3.bf16.xpose.msk.msra.mxu0 %vm868_vm1, %v556_v62  ;;  %577 = vmatpush3.bf16.xpose.msk.msra.mxu1 %vm868_vm1, %v556_v62 }
  0xe8   :  { %503 = vmatmul.mubr.msk.f32.vlgmr.msra.gmra.mrb[0].mxu0 %vm44_vm0, %v86_v14  ;;  %509 = vmatmul.mubr.msk.f32.vlgmr.msra.gmra.mrb[0].mxu1 %vm44_vm0, %v90_v15 }
  0xe9   :  { %505 = vmatprep.mubr.msk.f32.mxu0 %vm44_vm0, %v87_v12  ;;  %511 = vmatprep.mubr.msk.f32.mxu1 %vm44_vm0, %v91_v13 }
  0xec   :  { %506 = vmatmul.mubr.msk.f32.gmra.mrb[2].mxu0 %vm44_vm0, %v88_v8  ;;  %512 = vmatmul.mubr.msk.f32.gmra.mrb[2].mxu1 %vm44_vm0, %v92_v51 }
 0x1bb   :  { %v504_v58 = vpop.f32.mrb[0].mxu0  ;;  %v510_v53 = vpop.f32.mrb[0].mxu1 }
 0x1bc   :  { %v383_v59 = vand.u32 2147483647, %v504_v58  ;;  %v387_v52 = vand.u32 2147483647, %v510_v53  ;;  %v343_v9 = vpop.f32.mrb[1].mxu0  ;;  %v363_v18 = vpop.f32.mrb[1].mxu1 }
 0x1bd   :  { %v382_v19 = vand.u32 2147483647, %v343_v9  ;;  %v386_v20 = vand.u32 2147483647, %v363_v18 }
 0x1be   :  { %v391_v21 = vsub.f32 1.0, %v383_v59  ;;  %v395_v4 = vsub.f32 1.0, %v387_v52 }
 0x1bf   :  { %v390_v24 = vsub.f32 1.0, %v382_v19  ;;  %v394_v3 = vsub.f32 1.0, %v386_v20  ;;  %v507_v25 = vpop.f32.mrb[2].mxu0  ;;  %v513_v26 = vpop.f32.mrb[2].mxu1 }
 0x1c0   :  { %399 = vst [vmem:[#allocation2 + $0x8] sm:$0xff] %v391_v21  ;;  %403 = vst [vmem:[#allocation2 + $0x28] sm:$0xff] %v395_v4  ;;  %v385_v27 = vand.u32 2147483647, %v507_v25  ;;  %v389_v17 = vand.u32 2147483647, %v513_v26 }
 0x1c1   :  { %v353_v16 = vpop.f32.mrb[3].mxu0  ;;  %v373_v30 = vpop.f32.mrb[3].mxu1  ;;  %398 = vst [vmem:[#allocation2] sm:$0xff] %v390_v24  ;;  %402 = vst [vmem:[#allocation2 + $0x20] sm:$0xff] %v394_v3 }
 0x1c2   :  { %v384_v31 = vand.u32 2147483647, %v353_v16  ;;  %v388_v32 = vand.u32 2147483647, %v373_v30  ;;  %v393_v33 = vsub.f32 1.0, %v385_v27  ;;  %v397_v36 = vsub.f32 1.0, %v389_v17 }
 0x1c4   :  { %v392_v37 = vsub.f32 1.0, %v384_v31  ;;  %v396_v38 = vsub.f32 1.0, %v388_v32  ;;  %401 = vst [vmem:[#allocation2 + $0x18] sm:$0xff] %v393_v33  ;;  %405 = vst [vmem:[#allocation2 + $0x38] sm:$0xff] %v397_v36 }
 0x1c6   :  { %400 = vst [vmem:[#allocation2 + $0x10] sm:$0xff] %v392_v37  ;;  %404 = vst [vmem:[#allocation2 + $0x30] sm:$0xff] %v396_v38 }
 0x1c7   :  { %640 = shalt.err (!%p637_p4)
}
 0x1c8   :  { %s641_s4 = scalar_lea.hbm %s979_s2, 1024 }
 0x1c9   :  { %p642_p5 = scmp.ne.s32.totalorder %s979_s2, %s641_s4  ;;  %p645_p6 = scmp.lt.u32.totalorder %s641_s4, %s979_s2 }
 0x1cb   :  { %p647_p7 = pnand %p645_p6, %p642_p5 }
 0x1cd   :  { %650 = shalt.err (!%p647_p7)
}
 0x1ce   :  { %s654_s9 = smov 128   ;;  %s655_s10 = smov 8  }
 0x1cf   :  { %417 = dma.vmem_to_hbm [thread:$0]  %s412_s28, 1024, %s979_s2, [#allocation3], %s654_s9, %s654_s9, %s655_s10  }
 0x1d0   :  { %651 = dma.done.wait [#allocation3], 1024  }
 0x1d1   :  { %652 = vsyncadd [#allocation3], 4294966272 }
 0x1d2   :  { %421 = vsyncpa [#allocation3], 1 }

</bundles_post_ra>
